<compile_context>
chip_gen: v7x
topology: tpu7x:2x2x1
jax: 0.10.0
libtpu: 0.0.40
codegen_flags: <defaults>
</compile_context>

<pallas_src>
import functools

import jax
import jax.numpy as jnp
from jax import lax
from jax.experimental import pallas as pl
from jax.experimental.pallas import tpu as pltpu


def _groupnorm_kernel(x_ref, w_ref, b_ref, o_ref, *, eps):
    """Normalize `gb` groups and apply the per-channel affine.

    x_ref/o_ref: (1, gb, R, L) block -- gb groups of R*L elements each.
    w_ref/b_ref: (1, gb, R, 1) per-row (i.e. per-channel) affine params.
    """
    n = x_ref.shape[2] * x_ref.shape[3]           # elements per group
    denom = float(n - 1)                          # torch .var() is unbiased

    x = x_ref[...].astype(jnp.float32)            # (1, gb, R, L)

    # One fused pass over x: sum and sum-of-squares (lane reduce, then sublane).
    s1 = jnp.sum(jnp.sum(x, axis=3, keepdims=True), axis=2, keepdims=True)
    s2 = jnp.sum(jnp.sum(x * x, axis=3, keepdims=True), axis=2, keepdims=True)
    mean = s1 * (1.0 / n)                                      # (1, gb, 1, 1)
    var = jnp.maximum(s2 - s1 * mean, 0.0) / denom             # ddof=1
    inv = lax.rsqrt(var + eps)                                 # EUP

    # Fold normalization + affine into y = x*scale + shift (2 VALU ops/elem).
    w = w_ref[...].astype(jnp.float32)                         # (1, gb, R, 1)
    b = b_ref[...].astype(jnp.float32)
    scale = inv * w
    shift = b - mean * scale

    # Re-read x from VMEM for the normalize pass so the f32 copy above is not
    # kept live across the whole kernel (halves scratch for bf16 inputs).
    o_ref[...] = (x_ref[...].astype(jnp.float32) * scale + shift).astype(o_ref.dtype)


def _pick_groups_per_block(G, per_group_bytes, rows_per_group):
    """Largest divisor of G keeping a block <= ~4 MiB; prefer >= 8 sublanes."""
    gb = 1
    for d in range(1, G + 1):
        if G % d == 0 and d * per_group_bytes <= (4 << 20):
            gb = d
    if gb * rows_per_group < 8:  # bump for sublane density if it still fits
        for d in range(gb + 1, G + 1):
            if G % d == 0 and d * rows_per_group >= 8 and d * per_group_bytes <= (16 << 20):
                gb = d
                break
    return gb


def _groupnorm_call(x4, w4, b4, eps):
    """Run the kernel on x4: (N, G, R, L) with w4/b4: (1, G, R, 1)."""
    N, G, R, L = x4.shape
    per_group_bytes = R * L * x4.dtype.itemsize
    gb = _pick_groups_per_block(G, per_group_bytes, R)

    # VMEM budget: 2x-buffered in + out blocks (input dtype) + ~3 f32-block
    # temporaries + slack, clamped to 75% of physical VMEM (generation-aware:
    # ~96 MiB on v5e/v6e, ~48 MiB on v7x).
    blk_elems = gb * R * L
    need = 4 * blk_elems * x4.dtype.itemsize + 3 * blk_elems * 4 + (2 << 20)
    try:
        phys = int(getattr(pltpu.get_tpu_info(), "vmem_capacity_bytes", 64 << 20))
    except Exception:
        phys = 64 << 20
    cap = (phys * 3) // 4
    vmem_limit = int(min(max(need, 32 << 20), cap))

    kernel = functools.partial(_groupnorm_kernel, eps=float(eps))

    return pl.pallas_call(
        kernel,
        out_shape=jax.ShapeDtypeStruct(x4.shape, x4.dtype),
        grid=(N, G // gb),
        in_specs=[
            pl.BlockSpec((1, gb, R, L), lambda n, g: (n, g, 0, 0)),
            pl.BlockSpec((1, gb, R, 1), lambda n, g: (0, g, 0, 0)),
            pl.BlockSpec((1, gb, R, 1), lambda n, g: (0, g, 0, 0)),
        ],
        out_specs=pl.BlockSpec((1, gb, R, L), lambda n, g: (n, g, 0, 0)),
        compiler_params=pltpu.CompilerParams(
            dimension_semantics=("parallel", "parallel"),
            vmem_limit_bytes=vmem_limit,
        ),
    )(x4, w4, b4)


def _prep(x_part, w_part, b_part, n_groups, HW):
    """Build (x4, w4, b4) views for `n_groups` groups of `x_part` channels.

    x_part: (N, ch, H, W) with ch % n_groups == 0; w_part/b_part: (ch,) f32.
    When HW % 128 == 0 each group is flattened to (cpg*HW/128, 128) so the
    last dim is lane-dense; weight/bias are repeated per 128-lane row.
    """
    N, ch = x_part.shape[0], x_part.shape[1]
    cpg = ch // n_groups
    if HW % 128 == 0:
        rep = HW // 128
        R = cpg * rep
        x4 = x_part.reshape(N, n_groups, R, 128)
        w4 = jnp.repeat(w_part.reshape(n_groups, cpg, 1), rep, axis=2).reshape(1, n_groups, R, 1)
        b4 = jnp.repeat(b_part.reshape(n_groups, cpg, 1), rep, axis=2).reshape(1, n_groups, R, 1)
    else:
        x4 = x_part.reshape(N, n_groups, cpg, HW)
        w4 = w_part.reshape(1, n_groups, cpg, 1)
        b4 = b_part.reshape(1, n_groups, cpg, 1)
    return x4, w4, b4


def group_norm(x, weight, bias, num_groups=16, eps=1e-5):
    """Forward pass matching the PyTorch GroupNorm module exactly.

    x: (N, C, H, W); weight/bias: (1, C, 1, 1).
    """
    N, C, H, W = x.shape
    G = num_groups
    c = (C // G) * G
    if c == 0:
        c, G = C, C
    HW = H * W

    w_c = weight.reshape(C).astype(jnp.float32)
    b_c = bias.reshape(C).astype(jnp.float32)

    # Main path: first c channels -> G groups per sample, affine fused in-kernel.
    x4, w4, b4 = _prep(x[:, :c], w_c[:c], b_c[:c], G, HW)
    y = _groupnorm_call(x4, w4, b4, eps).reshape(N, c, H, W)

    # Remainder path: leftover channels form one group per sample.
    if c != C:
        rem = C - c
        xr, wr, br = _prep(x[:, c:], w_c[c:], b_c[c:], 1, HW)
        y_rem = _groupnorm_call(xr, wr, br, eps).reshape(N, rem, H, W)
        # TODO(synk): replace with an aliased single (N, C, H, W) output buffer
        # (input_output_aliases) to drop this full-output concat round trip.
        y = jnp.concatenate([y, y_rem], axis=1)

    return y


def group_norm_reference(x, weight, bias, num_groups=16, eps=1e-5):
    """Pure-JAX reference mirroring the PyTorch forward (unbiased var)."""
    N, C, H, W = x.shape
    G = num_groups
    c = (C // G) * G
    if c == 0:
        c, G = C, C
    x1 = x[:, :c].reshape(N, G, -1)
    mean = jnp.mean(x1, axis=-1, keepdims=True)
    var = jnp.var(x1, axis=-1, keepdims=True, ddof=1)
    x1 = (x1 - mean) / jnp.sqrt(var + eps)
    x1 = x1.reshape(N, c, H, W)
    if c != C:
        xt = x[:, c:].reshape(N, -1)
        mean = jnp.mean(xt, axis=-1).reshape(N, 1, 1, 1)
        var = jnp.var(xt, axis=-1, ddof=1).reshape(N, 1, 1, 1)
        xt = (x[:, c:] - mean) / jnp.sqrt(var + eps)
        x1 = jnp.concatenate([x1, xt], axis=1)
    return x1 * weight + bias


if __name__ == "__main__":
    key = jax.random.PRNGKey(0)

    # Case 1: C divisible by num_groups; HW = 256 exercises the lane-dense path.
    N, C, H, W = 2, 4, 16, 16
    num_groups = 2
    k1, k2, k3, key = jax.random.split(key, 4)
    x = jax.random.normal(k1, (N, C, H, W), dtype=jnp.float32)
    weight = 1.0 + 0.1 * jax.random.normal(k2, (1, C, 1, 1), dtype=jnp.float32)
    bias = 0.1 * jax.random.normal(k3, (1, C, 1, 1), dtype=jnp.float32)

    out = group_norm(x, weight, bias, num_groups=num_groups, eps=1e-5)
    out = jax.block_until_ready(out)
    ref = group_norm_reference(x, weight, bias, num_groups=num_groups, eps=1e-5)
    assert out.shape == (N, C, H, W)
    assert jnp.allclose(out, ref, rtol=1e-4, atol=1e-4), "case 1 mismatch"

    # Case 2: C not divisible by num_groups (remainder path, HW % 128 != 0).
    N2, C2, H2, W2 = 2, 6, 8, 8
    num_groups2 = 4  # c = 4, remainder = 2 channels
    k1, k2, k3, key = jax.random.split(key, 4)
    x2 = jax.random.normal(k1, (N2, C2, H2, W2), dtype=jnp.float32)
    w2 = 1.0 + 0.1 * jax.random.normal(k2, (1, C2, 1, 1), dtype=jnp.float32)
    b2 = 0.1 * jax.random.normal(k3, (1, C2, 1, 1), dtype=jnp.float32)

    out2 = group_norm(x2, w2, b2, num_groups=num_groups2, eps=1e-5)
    out2 = jax.block_until_ready(out2)
    ref2 = group_norm_reference(x2, w2, b2, num_groups=num_groups2, eps=1e-5)
    assert out2.shape == (N2, C2, H2, W2)
    assert jnp.allclose(out2, ref2, rtol=1e-4, atol=1e-4), "case 2 mismatch"

    print("KERNEL_OK")
</pallas_src>

<mosaic_0001>
module attributes {stable_mosaic.version = 11 : i64} {
  func.func @_groupnorm_kernel(%arg0: i32, %arg1: i32, %arg2: memref<1x2x4x128xf32, #tpu.memory_space<vmem>>, %arg3: memref<1x2x4x1xf32, #tpu.memory_space<vmem>>, %arg4: memref<1x2x4x1xf32, #tpu.memory_space<vmem>>, %arg5: memref<1x2x4x128xf32, #tpu.memory_space<vmem>>) attributes {dimension_semantics = [#tpu.dimension_semantics<parallel>, #tpu.dimension_semantics<parallel>], iteration_bounds = array<i64: 2, 1>, scalar_prefetch = 0 : i64, scratch_operands = 0 : i64, tpu.core_type = #tpu.core_type<tc>, window_params = [{transform_indices = @transform_0, window_bounds = array<i64: 1, 2, 4, 128>}, {transform_indices = @transform_1, window_bounds = array<i64: 1, 2, 4, 1>}, {transform_indices = @transform_2, window_bounds = array<i64: 1, 2, 4, 1>}, {transform_indices = @transform_3, window_bounds = array<i64: 1, 2, 4, 128>}]} {
    %c0 = arith.constant 0 : index
    %c0_0 = arith.constant 0 : index
    %c0_1 = arith.constant 0 : index
    %c0_2 = arith.constant 0 : index
    %0 = vector.load %arg2[%c0, %c0_0, %c0_1, %c0_2] : memref<1x2x4x128xf32, #tpu.memory_space<vmem>>, vector<1x2x4x128xf32>
    %cst = arith.constant dense<0.000000e+00> : vector<1x2x4xf32>
    %1 = vector.multi_reduction <add>, %0, %cst [3] : vector<1x2x4x128xf32> to vector<1x2x4xf32>
    %2 = vector.shape_cast %1 : vector<1x2x4xf32> to vector<1x2x4x1xf32>
    %cst_3 = arith.constant dense<0.000000e+00> : vector<1x2x1xf32>
    %3 = vector.multi_reduction <add>, %2, %cst_3 [2] : vector<1x2x4x1xf32> to vector<1x2x1xf32>
    %4 = vector.shape_cast %3 : vector<1x2x1xf32> to vector<1x2x1x1xf32>
    %5 = arith.mulf %0, %0 : vector<1x2x4x128xf32>
    %cst_4 = arith.constant dense<0.000000e+00> : vector<1x2x4xf32>
    %6 = vector.multi_reduction <add>, %5, %cst_4 [3] : vector<1x2x4x128xf32> to vector<1x2x4xf32>
    %7 = vector.shape_cast %6 : vector<1x2x4xf32> to vector<1x2x4x1xf32>
    %cst_5 = arith.constant dense<0.000000e+00> : vector<1x2x1xf32>
    %8 = vector.multi_reduction <add>, %7, %cst_5 [2] : vector<1x2x4x1xf32> to vector<1x2x1xf32>
    %9 = vector.shape_cast %8 : vector<1x2x1xf32> to vector<1x2x1x1xf32>
    %cst_6 = arith.constant 0.001953125 : f32
    %10 = vector.broadcast %cst_6 : f32 to vector<1x2x1x1xf32>
    %11 = arith.mulf %4, %10 : vector<1x2x1x1xf32>
    %12 = arith.mulf %4, %11 : vector<1x2x1x1xf32>
    %13 = arith.subf %9, %12 : vector<1x2x1x1xf32>
    %cst_7 = arith.constant 0.000000e+00 : f32
    %14 = vector.broadcast %cst_7 : f32 to vector<1x2x1x1xf32>
    %15 = arith.maximumf %13, %14 : vector<1x2x1x1xf32>
    %cst_8 = arith.constant 5.110000e+02 : f32
    %16 = vector.broadcast %cst_8 : f32 to vector<1x2x1x1xf32>
    %17 = arith.divf %15, %16 : vector<1x2x1x1xf32>
    %cst_9 = arith.constant 9.99999974E-6 : f32
    %18 = vector.broadcast %cst_9 : f32 to vector<1x2x1x1xf32>
    %19 = arith.addf %17, %18 : vector<1x2x1x1xf32>
    %20 = math.rsqrt %19 : vector<1x2x1x1xf32>
    %c0_10 = arith.constant 0 : index
    %c0_11 = arith.constant 0 : index
    %c0_12 = arith.constant 0 : index
    %c0_13 = arith.constant 0 : index
    %21 = vector.load %arg3[%c0_10, %c0_11, %c0_12, %c0_13] : memref<1x2x4x1xf32, #tpu.memory_space<vmem>>, vector<1x2x4x1xf32>
    %c0_14 = arith.constant 0 : index
    %c0_15 = arith.constant 0 : index
    %c0_16 = arith.constant 0 : index
    %c0_17 = arith.constant 0 : index
    %22 = vector.load %arg4[%c0_14, %c0_15, %c0_16, %c0_17] : memref<1x2x4x1xf32, #tpu.memory_space<vmem>>, vector<1x2x4x1xf32>
    %23 = vector.broadcast %20 : vector<1x2x1x1xf32> to vector<1x2x4x1xf32>
    %24 = arith.mulf %23, %21 : vector<1x2x4x1xf32>
    %25 = vector.broadcast %11 : vector<1x2x1x1xf32> to vector<1x2x4x1xf32>
    %26 = arith.mulf %25, %24 : vector<1x2x4x1xf32>
    %27 = arith.subf %22, %26 : vector<1x2x4x1xf32>
    %c0_18 = arith.constant 0 : index
    %c0_19 = arith.constant 0 : index
    %c0_20 = arith.constant 0 : index
    %c0_21 = arith.constant 0 : index
    %28 = vector.load %arg2[%c0_18, %c0_19, %c0_20, %c0_21] : memref<1x2x4x128xf32, #tpu.memory_space<vmem>>, vector<1x2x4x128xf32>
    %29 = vector.broadcast %24 : vector<1x2x4x1xf32> to vector<1x2x4x128xf32>
    %30 = arith.mulf %28, %29 : vector<1x2x4x128xf32>
    %31 = vector.broadcast %27 : vector<1x2x4x1xf32> to vector<1x2x4x128xf32>
    %32 = arith.addf %30, %31 : vector<1x2x4x128xf32>
    %c0_22 = arith.constant 0 : index
    %c0_23 = arith.constant 0 : index
    %c0_24 = arith.constant 0 : index
    %c0_25 = arith.constant 0 : index
    %33 = vector.load %arg5[%c0_22, %c0_23, %c0_24, %c0_25] : memref<1x2x4x128xf32, #tpu.memory_space<vmem>>, vector<1x2x4x128xf32>
    tpu.vector_store %arg5[%c0_22, %c0_23, %c0_24, %c0_25], %32 {strides = array<i32>} : memref<1x2x4x128xf32, #tpu.memory_space<vmem>>, vector<1x2x4x128xf32>,
    return
  }
  func.func @transform_0(%arg0: i32, %arg1: i32) -> (i32, i32, i32, i32) {
    %c0_i32 = arith.constant 0 : i32
    %c0_i32_0 = arith.constant 0 : i32
    %c0_i32_1 = arith.constant 0 : i32
    return %arg0, %arg1, %c0_i32, %c0_i32_0 : i32, i32, i32, i32
  }
  func.func @transform_1(%arg0: i32, %arg1: i32) -> (i32, i32, i32, i32) {
    %c0_i32 = arith.constant 0 : i32
    %c0_i32_0 = arith.constant 0 : i32
    %c0_i32_1 = arith.constant 0 : i32
    %c0_i32_2 = arith.constant 0 : i32
    return %c0_i32, %arg1, %c0_i32_0, %c0_i32_1 : i32, i32, i32, i32
  }
  func.func @transform_2(%arg0: i32, %arg1: i32) -> (i32, i32, i32, i32) {
    %c0_i32 = arith.constant 0 : i32
    %c0_i32_0 = arith.constant 0 : i32
    %c0_i32_1 = arith.constant 0 : i32
    %c0_i32_2 = arith.constant 0 : i32
    return %c0_i32, %arg1, %c0_i32_0, %c0_i32_1 : i32, i32, i32, i32
  }
  func.func @transform_3(%arg0: i32, %arg1: i32) -> (i32, i32, i32, i32) {
    %c0_i32 = arith.constant 0 : i32
    %c0_i32_0 = arith.constant 0 : i32
    %c0_i32_1 = arith.constant 0 : i32
    return %arg0, %arg1, %c0_i32, %c0_i32_0 : i32, i32, i32, i32
  }
}

</mosaic_0001>

<bundles_post_ra>
// kernel: tpu_custom_call.1
= control target key start
LH: loop header
LB: loop body
LE: loop exit
PB: predicated region body
PF: predicated region fallthrough
CT: control target
= control target key end

     0   :  { %8 = vsyncpa [#allocation3], 0  ;;  %s797_s0 = inlined_call_operand.vmem [shape: f32[2,2,4,128], index: 0, kind: input, shape index: {}]   ;;  %s798_s1 = inlined_call_operand.vmem [shape: f32[1,2,4,1], index: 1, kind: input, shape index: {}]   ;;  %s799_s2 = inlined_call_operand.vmem [shape: f32[1,2,4,1], index: 2, kind: input, shape index: {}]   ;;  %s800_s3 = inlined_call_operand.hbm [shape: f32[2,2,4,128], index: 3, kind: output, shape index: {}]  }
   0x1   :  { %10 = vsyncpa [#allocation3 + $0x1], 0  ;;  %s650_s12 = smov 0   ;;  %s652_s13 = smov 0  }
   0x2   :  { %s654_s14 = smov 0   ;;  %s656_s15 = smov 0  }
   0x3   :  { %s658_s16 = smov 0   ;;  %s660_s17 = smov 0  }
   0x4 LB: > { %s465_s18 = sadd.s32 4294967295, %s624_s17   ;;  %s466_s19 = sadd.s32 4294967294, %s624_s17   ;;  %s624_s17 = sphi %s660_s17, %s16_s17   ;;  %s620_s16 = sphi %s658_s16, %s807_s16   ;;  %s616_s15 = sphi %s656_s15, %s806_s15   ;;  %s612_s14 = sphi %s654_s14, %s805_s14   ;;  %s608_s13 = sphi %s652_s13, %s804_s13   ;;  %s604_s12 = sphi %s650_s12, %s803_s12  }
   0x5   : > { %s28_s20 = sadd.s32 1, %s620_s16  ;;  %s117_s21 = sadd.s32 1, %s612_s14 }
   0x6   : > { %p30_p0 = scmp.ge.s32.totalorder %s28_s20, 2  ;;  %p127_p1 = scmp.ne.s32.totalorder %s612_s14, %s608_s13 }
   0x7   : > { %p128_p2 = scmp.eq.s32.totalorder %s465_s18, 1  ;;  %p133_p3 = scmp.ne.s32.totalorder %s608_s13, %s604_s12 }
   0x8   : > { %s809_s20 = smov (%p30_p0, %s28_s20), 0  ;;  %p134_p5 = scmp.eq.s32.totalorder %s466_s19, 1 }
   0x9   : > { %p690_p4 = por %p128_p2, %p127_p1  ;;  %s112_s23 = ssub.s32 %s620_s16, %s809_s20 }
   0xa   : > { %p471_p6 = scmp.ge.s32.totalorder %s624_s17, 1  ;;  %p115_p7 = scmp.eq.s32.totalorder %s112_s23, 0 }
   0xb   : > { %p697_p8 = por %p134_p5, %p133_p3  ;;  %p183_p9 = scmp.lt.s32.totalorder %s624_s17, 3 }
   0xc   : > { %s703_s25 = scalar_select %p115_p7, %s612_s14, %s117_s21  }
   0xd   : > { %p184_p10 = pnand %p471_p6, %p183_p9 }
   0xe   : > { %p222_p11 = scmp.lt.s32.totalorder (!%p184_p10), %s616_s15, 1  ;;  %vm246_vm0 = vcmask (!%p184_p10), 1043456   ;;  %v626_v8 = vmov (!%p184_p10), 0   ;;  %v304_v53 = vld [vmem:[%s798_s1] sm:$0xf] (!%p184_p10)  ;;  %s218_s18 = sand.u32 (!%p184_p10), 1, %s608_s13  }
   0xf   : > { %187 = sbr.rel (%p184_p10) target bundleno = 365 (0x16d), region = 32  ;;  %540 = vset.pattern.permute.xlu0 (!%p184_p10), %v626_v8  ;;  %541 = vset.pattern.permute.xlu1 (!%p184_p10), %v626_v8  ;;  %v305_v56 = vld [vmem:[%s798_s1 + $0x4] sm:$0xf] (!%p184_p10)  ;;  %v306_v60 = vld [vmem:[%s799_s2] sm:$0xf] (!%p184_p10)  ;;  %s472_s19 = sshll.u32 (!%p184_p10), %s218_s18, 3 }
  0x10   : > { %v307_v63 = vld [vmem:[%s799_s2 + $0x4] sm:$0xf] (!%p184_p10)  ;;  %s220_s21 = scalar_lea.vmem (!%p184_p10), [#allocation2], %s472_s19 }
  0x11   : > { %s356_s23 = sshll.u32 (!%p184_p10), %s220_s21, 4  ;;  %s744_s23 = int_to_ptr.vmem [resolvable:$true] %s356_s23 }
  0x12   : > { %s546_s4 = scalar_lea.vmem (!%p184_p10), %s744_s23, 128 }
  0x13   : > { %p547_p12 = scmp.ne.s32.totalorder (!%p184_p10), %s744_s23, %s546_s4 }
  0x15   : > { %p548_p13 = pnand (!%p184_p10), %p547_p12, %p690_p4 }
  0x16   : > { %s223_s26 = scalar_select %p222_p11, %s616_s15, 1 }
  0x17   : > { %p549_p0 = pneg %p548_p13 }
  0x18   : > { %s480_s27 = sshll.u32 %s223_s26, 3  ;;  %s481_s26 = sshll.u32 %s616_s15, 7 }
  0x19   : > { %s229_s30 = scalar_lea.vmem %s797_s0, %s480_s27  ;;  %s749_s29 = scalar_lea.hbm %s800_s3, %s481_s26 }
  0x1a   : > { %v710_v0 = vld [vmem:[%s229_s30] sm:$0xf]  ;;  %v712_v1 = vld [vmem:[%s229_s30 + $0x4] sm:$0xf]  ;;  %s751_s30 = scalar_lea.sflag [#allocation3], %s218_s18  ;;  %s627_s15 = smov [#allocation2]  }
  0x1b   : > { %v247_v2 = vsel %vm246_vm0, %v710_v0, 0.0  ;;  %v267_v3 = vmul.f32 %v710_v0, %v710_v0  ;;  %v268_v4 = vmul.f32 %v712_v1, %v712_v1  ;;  %v250_v6 = vsel %vm246_vm0, %v712_v1, 0.0  ;;  %s550_s5 = sshll.u32 %s627_s15, 4  ;;  %s551_s5 = int_to_ptr.vmem [resolvable:$false] %s550_s5 }
  0x1c   : > { %248 = vadd.xlane.f32.xlu0 %v247_v2  ;;  %s552_s6 = scalar_lea.vmem %s551_s5, 256  ;;  %p553_p1 = scmp.lt.s32.totalorder %s744_s23, %s551_s5 }
  0x1d   : > { %v269_v5 = vsel %vm246_vm0, %v267_v3, 0.0  ;;  %v272_v7 = vsel %vm246_vm0, %v268_v4, 0.0  ;;  %p554_p2 = scmp.lt.s32.totalorder %s552_s6, %s546_s4 }
  0x1e   : > { %270 = vadd.xlane.f32.xlu1 %v269_v5 }
  0x1f   : > { %p555_p3 = por %p554_p2, %p553_p1 }
  0x20   : > { %251 = vadd.xlane.f32.xlu0 %v250_v6 }
  0x21   : > { %p556_p5 = pnand %p555_p3, %p549_p0 }
  0x22   : > { %273 = vadd.xlane.f32.xlu1 %v272_v7 }
  0xa9   : > { %v249_v9 = vpop.xlane.xlu0 %248 }
  0xaa   : > { %v253_v10 = vsel %vm246_vm0, %v249_v9, 0.0 }
  0xab   : > { %v254_v11 = vrot.slane %v253_v10, 4  ;;  %v271_v12 = vpop.xlane.xlu1 %270 }
  0xac   : > { %v275_v13 = vsel %vm246_vm0, %v271_v12, 0.0 }
  0xad   : > { %v255_v14 = vadd.f32 %v254_v11, %v253_v10  ;;  %v276_v15 = vrot.slane %v275_v13, 4  ;;  %v252_v16 = vpop.xlane.xlu0 %251 }
  0xae   : > { %v260_v17 = vsel %vm246_vm0, %v252_v16, 0.0 }
  0xaf   : > { %v256_v18 = vrot.slane %v255_v14, 2  ;;  %v277_v19 = vadd.f32 %v276_v15, %v275_v13  ;;  %v261_v20 = vrot.slane %v260_v17, 4  ;;  %v274_v21 = vpop.xlane.xlu1 %273 }
  0xb0   : > { %v282_v22 = vsel %vm246_vm0, %v274_v21, 0.0 }
  0xb1   : > { %v257_v23 = vadd.f32 %v256_v18, %v255_v14  ;;  %v278_v24 = vrot.slane %v277_v19, 2  ;;  %v262_v25 = vadd.f32 %v261_v20, %v260_v17  ;;  %v283_v26 = vrot.slane %v282_v22, 4 }
  0xb3   : > { %v258_v27 = vrot.slane %v257_v23, 1  ;;  %v279_v28 = vadd.f32 %v278_v24, %v277_v19  ;;  %v263_v29 = vrot.slane %v262_v25, 2  ;;  %v284_v30 = vadd.f32 %v283_v26, %v282_v22 }
  0xb5   : > { %v259_v31 = vadd.f32 %v258_v27, %v257_v23  ;;  %v280_v32 = vrot.slane %v279_v28, 1  ;;  %v264_v33 = vadd.f32 %v263_v29, %v262_v25  ;;  %v285_v34 = vrot.slane %v284_v30, 2 }
  0xb7   : > { %v289_v35 = vmul.f32 0.001953125, %v259_v31  ;;  %v265_v36 = vrot.slane %v264_v33, 1  ;;  %v286_v37 = vadd.f32 %v285_v34, %v284_v30  ;;  %v281_v39 = vadd.f32 %v280_v32, %v279_v28 }
  0xb9   : > { %v291_v38 = vmul.f32 %v289_v35, %v259_v31  ;;  %v266_v40 = vadd.f32 %v265_v36, %v264_v33  ;;  %v287_v41 = vrot.slane %v286_v37, 1 }
  0xbb   : > { %v293_v42 = vsub.f32 %v281_v39, %v291_v38  ;;  %v290_v43 = vmul.f32 0.001953125, %v266_v40  ;;  %v288_v46 = vadd.f32 %v287_v41, %v286_v37 }
  0xbd   : > { %v295_v44 = vmax.f32 %v293_v42, 0.0  ;;  %v292_v45 = vmul.f32 %v290_v43, %v266_v40 }
  0xbf   : > { %v298_v47 = vmul.f32 0.0019569471, %v295_v44  ;;  %v294_v48 = vsub.f32 %v288_v46, %v292_v45 }
  0xc1   : > { %v300_v49 = vadd.f32 1e-05, %v298_v47  ;;  %v296_v50 = vmax.f32 %v294_v48, 0.0 }
  0xc3   : > { %542 = vrsqrt.f32 %v300_v49  ;;  %v299_v51 = vmul.f32 0.0019569471, %v296_v50 }
  0xc5   : > { %v301_v52 = vadd.f32 1e-05, %v299_v51 }
  0xc7   : > { %544 = vrsqrt.f32 %v301_v52 }
  0xcd   : > { %v543_v54 = vpop.eup %542 }
  0xce   : > { %v308_v55 = vmul.f32 %v543_v54, %v304_v53 }
  0xd0   : > { %316 = vperm.xlu0 %540, %v308_v55   ;;  %v310_v59 = vmul.f32 %v308_v55, %v289_v35 }
  0xd1   : > { %v545_v57 = vpop.eup %544 }
  0xd2   : > { %v309_v58 = vmul.f32 %v545_v57, %v305_v56  ;;  %v312_v61 = vsub.f32 %v306_v60, %v310_v59 }
  0xd4   : > { %321 = vperm.xlu1 %541, %v309_v58   ;;  %v311_v62 = vmul.f32 %v309_v58, %v290_v43 }
  0xd6   : > { %v313_v2 = vsub.f32 %v307_v63, %v311_v62 }
  0xd8   : > { %328 = vperm.xlu1 %541, %v312_v61  }
  0xdc   : > { %333 = vperm.xlu1 %541, %v313_v2  }
 0x14f   : > { %v317_v3 = vpop.permute.xlu0 %316 }
 0x150   : > { %v324_v5 = vmul.f32 %v317_v3, %v710_v0 }
 0x153   : > { %v322_v4 = vpop.permute.xlu1 %321 }
 0x154   : > { %v325_v8 = vmul.f32 %v322_v4, %v712_v1 }
 0x157   : > { %v329_v6 = vpop.permute.xlu1 %328 }
 0x158   : > { %v336_v7 = vadd.f32 %v329_v6, %v324_v5 }
 0x15a   : > { %338 = vst [vmem:[%s220_s21] sm:$0xf] %v336_v7 }
 0x15b   : > { %v334_v9 = vpop.permute.xlu1 %333 }
 0x15c   : > { %v337_v0 = vadd.f32 %v334_v9, %v325_v8 }
 0x15e   : > { %339 = vst [vmem:[%s220_s21 + $0x4] sm:$0xf] %v337_v0 }
 0x15f   : > { %559 = shalt.err (!%p556_p5)
}
 0x160   : > { %s560_s7 = scalar_lea.hbm %s749_s29, 128  ;;  %s564_s10 = scalar_lea.hbm %s800_s3, 256 }
 0x161   : > { %p561_p6 = scmp.ne.s32.totalorder %s749_s29, %s560_s7  ;;  %p565_p10 = scmp.lt.u32.totalorder %s749_s29, %s800_s3 }
 0x162   : > { %p566_p11 = scmp.lt.u32.totalorder %s564_s10, %s560_s7  ;;  %p568_p13 = scmp.lt.u32.totalorder %s560_s7, %s749_s29 }
 0x163   : > { %p562_p7 = pnand %p561_p6, %p690_p4 }
 0x164   : > { %p567_p12 = por %p566_p11, %p565_p10 }
 0x165   : > { %p563_p9 = pneg %p562_p7 }
 0x166   : > { %p569_p0 = por %p568_p13, %p567_p12 }
 0x168   : > { %p570_p1 = pnand %p569_p0, %p563_p9 }
 0x16a   : > { %573 = shalt.err (!%p570_p1)
}
 0x16b   : > { %s628_s19 = smov 64   ;;  %s629_s21 = smov 4  }
 0x16c   : > { %482 = dma.vmem_to_hbm [thread:$0]  (%p690_p4), %s744_s23, 128, %s749_s29, %s751_s30, %s628_s19, %s628_s19, %s629_s21  }
 0x16d PF: > { %p488_p2 = scmp.ge.s32.totalorder %s624_s17, 2  ;;  %s371_s26 = sand.u32 1, %s604_s12  }
 0x16e   : > { %s372_s27 = scalar_lea.sflag [#allocation3], %s371_s26 }
 0x16f   : > { %p485_p3 = pnand %p488_p2, %p697_p8 }
 0x171   : > { %599 = dma.done.wait (!%p485_p3), %s372_s27, 128  }
 0x172   : > { %601 = vsyncadd (!%p485_p3), %s372_s27, 4294967168  ;;  %s16_s17 = sadd.s32 1, %s624_s17   ;;  %s803_s12 = smov %s608_s13 }
 0x173   : > { %p13_p5 = scmp.ge.s32.totalorder %s16_s17, 4   ;;  %s804_s13 = smov %s612_s14 }
 0x174   : > { %s805_s14 = smov %s703_s25  ;;  %s806_s15 = smov %s620_s16 }
 0x175   : > { %s807_s16 = smov %s809_s20  ;;  %15 = sbr.rel (!%p13_p5) target bundleno = 4 (0x4), region = 73 }
 0x17c   :  { %377 = vsyncpa [#allocation3], 1 }
 0x17d   :  { %379 = vsyncpa [#allocation3 + $0x1], 1 }

</bundles_post_ra>
